<compile_context>
chip_gen: v7x
topology: tpu7x:2x2x1
jax: 0.10.0
libtpu: 0.0.40
codegen_flags: <defaults>
</compile_context>

<pallas_src>
import math

import jax
import jax.numpy as jnp
import numpy as np
from jax.experimental import pallas as pl
from jax.experimental.pallas import tpu as pltpu


# ----------------------------------------------------------------------------
# Hardware sizing (cached host-side query)
# ----------------------------------------------------------------------------

_VMEM_CAPACITY = None


def _tpu_vmem_capacity_bytes():
    """Per-core VMEM capacity; conservative 64 MiB if the query fails."""
    global _VMEM_CAPACITY
    if _VMEM_CAPACITY is None:
        try:
            _VMEM_CAPACITY = int(pltpu.get_tpu_info().vmem_capacity_bytes)
        except Exception:
            _VMEM_CAPACITY = 64 << 20  # v7x per-TC (most restrictive)
    return _VMEM_CAPACITY


def _block_byte_cap():
    # 128 MiB parts (v5e/v6e): 8 MiB blocks; 64 MiB parts (v7x): 4 MiB blocks.
    # With in+out double-buffered that is 32 MiB / 16 MiB of VMEM respectively.
    return (8 << 20) if _tpu_vmem_capacity_bytes() >= (128 << 20) else (4 << 20)


def _vmem_limit_bytes():
    # 8 MiB blocks need >32 MiB scoped VMEM -> raise limit on 128 MiB parts.
    return (64 << 20) if _tpu_vmem_capacity_bytes() >= (128 << 20) else None


# ----------------------------------------------------------------------------
# Kernels
# ----------------------------------------------------------------------------

def _copy_kernel(x_ref, o_ref):
    # Pure VMEM -> VMEM pass-through (lane-dense, full-tile vld/vst).
    o_ref[...] = x_ref[...]


def _hbm_dma_copy_kernel(x_hbm, o_hbm, sem):
    # Direct HBM -> HBM DMA: no VMEM staging, no VPU load/store slots.
    cp = pltpu.make_async_copy(x_hbm, o_hbm, sem)
    cp.start()
    cp.wait()


# ----------------------------------------------------------------------------
# Tiling decisions
# ----------------------------------------------------------------------------

def _pick_tile_rows(rows, max_tile_rows, gran):
    """Pick tile_rows <= max_tile_rows that (a) is a multiple of the dtype's
    sublane-packing granularity, (b) divides rows evenly when possible (no
    ragged masked-store last tile), and (c) leaves at least 2 grid steps so
    both v7x TensorCores get work under the 'parallel' split."""
    upper = min(rows, max_tile_rows)
    if upper == rows and rows >= 2 * gran:
        # Byte cap did not force multiple steps -> force an ~even 2-way split.
        upper = max(gran, (rows // 2 // gran) * gran)
    # Search downward (in granularity steps) for a divisor of rows.
    t = (upper // gran) * gran
    while t >= gran:
        if rows % t == 0:
            return t
        t -= gran
    # No aligned divisor: largest aligned value (ragged last tile is masked).
    t = (upper // gran) * gran
    if t >= gran:
        return t
    return max(1, min(upper, rows))


def _choose_2d_layout(total, itemsize):
    """Lane-dense (rows, lanes) view plus a row-tile size, or None if the
    element count is not a multiple of 128."""
    cap_bytes = _block_byte_cap()
    gran = max(8, 32 // itemsize)  # 8 rows f32 / 16 bf16 / 32 int8 sublane packing
    for lanes in (1024, 512, 256, 128):
        if total >= lanes and total % lanes == 0:
            rows = total // lanes
            max_tile_rows = max(gran, cap_bytes // (lanes * itemsize))
            tile_rows = _pick_tile_rows(rows, max_tile_rows, gran)
            return rows, lanes, tile_rows
    return None


# ----------------------------------------------------------------------------
# Pallas identity-copy variants
# ----------------------------------------------------------------------------

def _tiled_copy_2d(x2, tile_rows, alias):
    rows, lanes = x2.shape
    alias_kw = {"input_output_aliases": {0: 0}} if alias else {}
    return pl.pallas_call(
        _copy_kernel,
        out_shape=jax.ShapeDtypeStruct((rows, lanes), x2.dtype),
        grid=(pl.cdiv(rows, tile_rows),),
        in_specs=[pl.BlockSpec((tile_rows, lanes), lambda i: (i, 0))],
        out_specs=pl.BlockSpec((tile_rows, lanes), lambda i: (i, 0)),
        compiler_params=pltpu.CompilerParams(
            # "parallel": shards the row-tile grid across v7x's 2 TensorCores
            # (neutral on single-TC v5e/v6e).
            dimension_semantics=("parallel",),
            vmem_limit_bytes=_vmem_limit_bytes(),
        ),
        # Bandwidth-only custom call: let XLA schedule/overlap around it.
        cost_estimate=pl.CostEstimate(
            flops=0, transcendentals=0, bytes_accessed=2 * x2.size * x2.dtype.itemsize
        ),
        **alias_kw,
    )(x2)


def _identity_copy_vmem(x, alias):
    """Identity as a lane-dense, pipelined, optionally aliased VMEM copy."""
    if x.size == 0:
        return x
    total = x.size
    itemsize = jnp.dtype(x.dtype).itemsize
    layout = _choose_2d_layout(total, itemsize)

    if layout is not None:
        rows, lanes, tile_rows = layout
        y2 = _tiled_copy_2d(x.reshape(rows, lanes), tile_rows, alias)
        return y2.reshape(x.shape)

    # Fallback for element counts that are not a multiple of 128: pad the
    # flattened array up to a lane multiple, run the same tiled/pipelined
    # copy (no single-giant-block VMEM blowup), then slice back.
    lanes = 128
    pad = (-total) % lanes
    flat = jnp.pad(x.reshape(-1), (0, pad))
    rows = (total + pad) // lanes
    gran = max(8, 32 // itemsize)
    max_tile_rows = max(gran, _block_byte_cap() // (lanes * itemsize))
    tile_rows = _pick_tile_rows(rows, max_tile_rows, gran)
    # The padded array is a fresh temp, so aliasing it is always safe/free.
    y2 = _tiled_copy_2d(flat.reshape(rows, lanes), tile_rows, alias=True)
    return y2.reshape(-1)[:total].reshape(x.shape)


def _identity_copy_hbm_dma(x):
    """Identity as a single direct HBM->HBM DMA (zero VMEM footprint)."""
    if x.size == 0:
        return x
    return pl.pallas_call(
        _hbm_dma_copy_kernel,
        out_shape=jax.ShapeDtypeStruct(x.shape, x.dtype),
        in_specs=[pl.BlockSpec(memory_space=pl.ANY)],
        out_specs=pl.BlockSpec(memory_space=pl.ANY),
        scratch_shapes=[pltpu.SemaphoreType.DMA],
        cost_estimate=pl.CostEstimate(
            flops=0, transcendentals=0, bytes_accessed=2 * x.size * x.dtype.itemsize
        ),
    )(x)


# ----------------------------------------------------------------------------
# Describe_Layer forward
# ----------------------------------------------------------------------------

# One-time-print state, keyed by layer name (mirrors Describe_Layer.first_pass).
_FIRST_PASS = {}


def describe_layer_forward(x, *, name="describe", show=True, endl="",
                           copy_mode="identity", alias_input=False):
    """Pallas equivalent of Describe_Layer.forward.

    Prints shape info on the first call for `name` (host side, like the
    PyTorch module), then returns x unchanged.

    copy_mode:
      "identity" (default): zero device work -- recommended, the layer IS the
                            identity.
      "vmem":     lane-dense, tiled, software-pipelined VMEM identity copy
                  (explicit kernel boundary).
      "hbm_dma":  direct HBM->HBM DMA copy, no VMEM staging.

    alias_input (copy_mode="vmem" only): set input_output_aliases={0: 0}.
      Only do this when the caller donates x (e.g. jax.jit(..., donate_argnums));
      without donation XLA inserts a defensive copy and the alias is a net loss.

    NOTE: under jax.jit the print fires at trace time only (host-side
    side-effect); this is the closest analogue of the PyTorch behavior.
    """
    if show and _FIRST_PASS.get(name, True):
        s = tuple(x.shape)
        if len(s) >= 4:
            k = round(s[1] * s[2] * s[3] / 1000.0, 1)
        else:  # guard against non-4D inputs (PyTorch code would IndexError)
            k = round((math.prod(s) if s else 1) / 1000.0, 1)
        print(f"{name}: {s} {k} \x08k {endl}")
        _FIRST_PASS[name] = False

    if copy_mode == "identity":
        return x  # zero HBM traffic (the recommended path)
    if copy_mode == "hbm_dma":
        return _identity_copy_hbm_dma(x)
    if copy_mode == "vmem":
        return _identity_copy_vmem(x, alias=alias_input)
    raise ValueError(f"unknown copy_mode: {copy_mode!r}")


if __name__ == "__main__":
    key = jax.random.PRNGKey(0)
    # NCHW input, small shapes consistent with a conv-net feature map.
    x = jax.random.normal(key, (2, 4, 16, 16), dtype=jnp.float32)
    x_host = np.asarray(x)  # host reference copy

    # 1) Default (recommended) path: identity, no device copy at all.
    y0 = describe_layer_forward(x, name="feat", show=True)
    assert y0 is x

    # 2) Explicit Pallas VMEM-tiled identity copy (lane-dense, pipelined).
    y1 = describe_layer_forward(x, name="feat", show=True, copy_mode="vmem")
    y1 = jax.block_until_ready(y1)
    assert y1.shape == x.shape and y1.dtype == x.dtype
    assert np.array_equal(np.asarray(y1), x_host)

    # 3) Direct HBM->HBM DMA identity copy (no VMEM staging).
    y2 = describe_layer_forward(x, name="feat", show=False, copy_mode="hbm_dma")
    y2 = jax.block_until_ready(y2)
    assert np.array_equal(np.asarray(y2), x_host)

    # 4) Fallback path: element count not a multiple of 128 (padded + tiled).
    x3 = jax.random.normal(jax.random.PRNGKey(1), (3, 5, 7), dtype=jnp.float32)
    y3 = describe_layer_forward(x3, name="odd", show=False, copy_mode="vmem")
    y3 = jax.block_until_ready(y3)
    assert y3.shape == x3.shape
    assert np.array_equal(np.asarray(y3), np.asarray(x3))

    print("KERNEL_OK")
</pallas_src>

<mosaic_0001>
module attributes {stable_mosaic.version = 11 : i64} {
  func.func @_copy_kernel(%arg0: i32, %arg1: memref<2x1024xf32, #tpu.memory_space<vmem>>, %arg2: memref<2x1024xf32, #tpu.memory_space<vmem>>) attributes {dimension_semantics = [#tpu.dimension_semantics<parallel>], iteration_bounds = array<i64: 1>, scalar_prefetch = 0 : i64, scratch_operands = 0 : i64, tpu.core_type = #tpu.core_type<tc>, window_params = [{transform_indices = @transform_0, window_bounds = array<i64: 2, 1024>}, {transform_indices = @transform_1, window_bounds = array<i64: 2, 1024>}]} {
    %c0 = arith.constant 0 : index
    %c0_0 = arith.constant 0 : index
    %0 = vector.load %arg1[%c0, %c0_0] : memref<2x1024xf32, #tpu.memory_space<vmem>>, vector<2x1024xf32>
    %c0_1 = arith.constant 0 : index
    %c0_2 = arith.constant 0 : index
    %1 = vector.load %arg2[%c0_1, %c0_2] : memref<2x1024xf32, #tpu.memory_space<vmem>>, vector<2x1024xf32>
    tpu.vector_store %arg2[%c0_1, %c0_2], %0 {strides = array<i32>} : memref<2x1024xf32, #tpu.memory_space<vmem>>, vector<2x1024xf32>,
    return
  }
  func.func @transform_0(%arg0: i32) -> (i32, i32) {
    %c0_i32 = arith.constant 0 : i32
    %c0_i32_0 = arith.constant 0 : i32
    return %arg0, %c0_i32 : i32, i32
  }
  func.func @transform_1(%arg0: i32) -> (i32, i32) {
    %c0_i32 = arith.constant 0 : i32
    %c0_i32_0 = arith.constant 0 : i32
    return %arg0, %c0_i32 : i32, i32
  }
}

</mosaic_0001>

<bundles_post_ra>
// kernel: tpu_custom_call.1
= control target key start
LH: loop header
LB: loop body
LE: loop exit
PB: predicated region body
PF: predicated region fallthrough
CT: control target
= control target key end

     0   :  { %6 = vsyncpa [#allocation3], 0  ;;  %s126_s0 = inlined_call_operand.hbm [shape: f32[2,1024], index: 0, kind: input, shape index: {}]   ;;  %s127_s1 = inlined_call_operand.hbm [shape: f32[2,1024], index: 1, kind: output, shape index: {}]  }
   0x1   :  { %7 = vsyncpa [#allocation4], 0  ;;  %s90_s6 = smov [#allocation2]   ;;  %s42_s10 = scalar_lea.hbm %s126_s0, 256 }
   0x2   :  { %s14_s7 = sshll.u32 %s90_s6, 4  ;;  %p43_p0 = scmp.ne.s32.totalorder %s126_s0, %s42_s10  ;;  %s15_s7 = int_to_ptr.vmem [resolvable:$true] %s14_s7 }
   0x3   :  { %p46_p1 = scmp.lt.u32.totalorder %s42_s10, %s126_s0 }
   0x5   :  { %p48_p2 = pnand %p46_p1, %p43_p0 }
   0x7   :  { %51 = shalt.err (!%p48_p2)
}
   0x8   :  { %s52_s15 = scalar_lea.vmem %s15_s7, 256  ;;  %p57_p4 = scmp.lt.s32.totalorder %s15_s7, %s15_s7 }
   0x9   :  { %p53_p3 = scmp.ne.s32.totalorder %s15_s7, %s52_s15  ;;  %p58_p5 = scmp.lt.s32.totalorder %s52_s15, %s52_s15 }
   0xb   :  { %p59_p6 = por %p58_p5, %p57_p4 }
   0xd   :  { %p60_p7 = pnand %p59_p6, %p53_p3 }
   0xf   :  { %63 = shalt.err (!%p60_p7)
}
  0x10   :  { %17 = dma.hbm_to_vmem [thread:$0]  %s126_s0, 256, %s15_s7, [#allocation3]  }
  0x11   :  { %86 = dma.done.wait [#allocation3], 256  }
  0x12   :  { %87 = vsyncadd [#allocation3], 4294967040  ;;  %s91_s18 = smov [#allocation5]   ;;  %v21_v0 = vld [vmem:[#allocation2] sm:$0xff]  ;;  %v22_v1 = vld [vmem:[#allocation2 + $0x8] sm:$0xff] }
  0x13   :  { %s31_s19 = sshll.u32 %s91_s18, 4  ;;  %23 = vst [vmem:[#allocation5] sm:$0xff] %v21_v0  ;;  %24 = vst [vmem:[#allocation5 + $0x8] sm:$0xff] %v22_v1  ;;  %s32_s19 = int_to_ptr.vmem [resolvable:$true] %s31_s19 }
  0x14   :  { %s64_s20 = scalar_lea.vmem %s32_s19, 256  ;;  %p69_p9 = scmp.lt.s32.totalorder %s32_s19, %s32_s19 }
  0x15   :  { %p65_p8 = scmp.ne.s32.totalorder %s32_s19, %s64_s20  ;;  %p70_p10 = scmp.lt.s32.totalorder %s64_s20, %s64_s20 }
  0x17   :  { %p71_p11 = por %p70_p10, %p69_p9 }
  0x19   :  { %p72_p12 = pnand %p71_p11, %p65_p8 }
  0x1b   :  { %75 = shalt.err (!%p72_p12)
}
  0x1c   :  { %s76_s0 = scalar_lea.hbm %s127_s1, 256 }
  0x1d   :  { %p77_p13 = scmp.ne.s32.totalorder %s127_s1, %s76_s0  ;;  %p80_p0 = scmp.lt.u32.totalorder %s76_s0, %s127_s1 }
  0x1f   :  { %p82_p1 = pnand %p80_p0, %p77_p13 }
  0x21   :  { %85 = shalt.err (!%p82_p1)
}
  0x22   :  { %34 = dma.vmem_to_hbm [thread:$0]  %s32_s19, 256, %s127_s1, [#allocation4]  }
  0x23   :  { %88 = dma.done.wait [#allocation4], 256  }
  0x24   :  { %89 = vsyncadd [#allocation4], 4294967040 }
  0x25   :  { %38 = vsyncpa [#allocation3], 1 }
  0x26   :  { %39 = vsyncpa [#allocation4], 1 }

</bundles_post_ra>
